<compile_context>
chip_gen: v5e
topology: v5e:2x2
jax: 0.10.0
libtpu: 0.0.40
codegen_flags: <defaults>
</compile_context>

<pallas_src>
import jax
import jax.numpy as jnp
from jax.experimental import pallas as pl
from jax.experimental.pallas import tpu as pltpu


# ----------------------------------------------------------------------------
# Fused kernel: Conv1d + ReLU + MaxPool1d + (identity attention) + Linear
# ----------------------------------------------------------------------------
def fused_cnn_kernel(x_ref, wk_ref, bconv_ref, wfc_ref, bfc_ref, out_ref, conv_scr):
    # x_ref    : (N, Cin)   N = L * Bt, time-major rows within the tile: row = t*Bt + b
    # wk_ref   : (3, Cin, H) conv weight, tap-major (wk[k, ci, h] == torch W[h, ci, k])
    # bconv_ref: (1, H)      conv bias
    # wfc_ref  : (Lp, H, O)  fc weight, wfc[t, h, o] == torch fc W[o, h*Lp + t]
    # bfc_ref  : (1, O)      fc bias
    # out_ref  : (Bt, O)
    # conv_scr : (N, H)      VMEM scratch for the ReLU'd conv output
    N, _ = x_ref.shape
    Bt, O = out_ref.shape
    H = conv_scr.shape[1]
    L = N // Bt
    Lp = L // 2

    x00 = x_ref[...]

    # Conv1d(k=3, padding=1): neighbour taps via sublane rotations (XLU slot — idle
    # here).  The wrap-around rows are exactly the t==0 / t==L-1 zero-padding rows;
    # kill them with in-kernel iota masks (no HBM mask inputs, no staging copy).
    row = jax.lax.broadcasted_iota(jnp.int32, (N, 1), 0)
    keep_first = (row >= Bt).astype(jnp.float32)        # zero rows with t == 0
    keep_last = (row < (N - Bt)).astype(jnp.float32)    # zero rows with t == L-1
    x_m1 = pltpu.roll(x00, shift=Bt, axis=0) * keep_first       # x[t-1, b]
    x_p1 = pltpu.roll(x00, shift=N - Bt, axis=0) * keep_last    # x[t+1, b]

    conv = (jnp.dot(x_m1, wk_ref[0], preferred_element_type=jnp.float32)
            + jnp.dot(x00, wk_ref[1], preferred_element_type=jnp.float32)
            + jnp.dot(x_p1, wk_ref[2], preferred_element_type=jnp.float32)
            + bconv_ref[...])                            # (N, H)
    conv_scr[...] = jnp.maximum(conv, 0.0)               # ReLU

    # MaxPool1d(2) fused with the final Linear.  Time-major layout makes the two
    # conv rows of every batch element contiguous, so the reads below are aligned
    # sublane slices; each pooled (Bt, H) block is contracted against its (H, O)
    # fc-weight slice immediately — no flattened-feature scratch, no lane-sparse
    # masked stores.
    def body(t, acc):
        base = pl.multiple_of(2 * t * Bt, 8)
        pooled = jnp.maximum(conv_scr[pl.ds(base, Bt), :],
                             conv_scr[pl.ds(base + Bt, Bt), :])      # (Bt, H)
        return acc + jnp.dot(pooled, wfc_ref[t],
                             preferred_element_type=jnp.float32)     # (Bt, O)

    acc0 = jnp.zeros((Bt, O), jnp.float32)
    acc = jax.lax.fori_loop(0, Lp, body, acc0,
                            unroll=True if Lp <= 16 else 8)

    # SelfAttention over a length-1 sequence: softmax of a single logit is exactly
    # 1.0, so attended == features and the projection MLP is dead compute.
    out_ref[...] = acc + bfc_ref[...]


# ----------------------------------------------------------------------------
# Generation-aware tiling
# ----------------------------------------------------------------------------
def _round_up(n, m):
    return ((n + m - 1) // m) * m


def _pad128(n):
    return _round_up(n, 128)


def _vmem_capacity_bytes():
    try:
        return int(pltpu.get_tpu_info().vmem_capacity_bytes)
    except Exception:
        return 64 * 1024 * 1024  # conservative fallback (v7x-sized)


def _choose_tiling(B, L, Cin, H, O):
    """Pick (Bt, nb, B_pad, vmem_limit) from the actual chip's VMEM capacity."""
    Lp = L // 2
    cap = _vmem_capacity_bytes()
    budget = cap // 3                        # per-step working-set target

    # Constant weight/bias blocks (double-buffered by default), with sublane(8)/
    # lane(128) padding of narrow dims included.
    const_bytes = 2 * 4 * (3 * _round_up(Cin, 8) * _pad128(H)        # wk
                           + Lp * _round_up(H, 8) * _pad128(O)       # wfc (Lp,H,O)
                           + 8 * _pad128(H) + 8 * _pad128(O))        # biases

    # Per-batch-row bytes per grid step (lane padding + double buffering included).
    row_bytes = 4 * (2 * L * _pad128(Cin)    # x block, double-buffered
                     + 2 * L * _pad128(Cin)  # rolled taps live in vregs / spill
                     + L * _pad128(H)        # conv scratch
                     + 2 * _pad128(O))       # output block, double-buffered

    usable = max(budget - const_bytes, 8 * row_bytes)
    max_rows = max(8, (usable // row_bytes) // 8 * 8)

    B8 = _round_up(B, 8)
    nb = -(-B8 // max_rows)                  # ceil-div
    if nb == 1 and B8 >= 16:
        nb = 2   # let the "parallel" grid axis feed both TensorCores (v7x); ~free on 1-TC chips
    Bt = _round_up(-(-B8 // nb), 8)
    B_pad = Bt * nb

    vmem_limit = int(max(32 * 2**20, min(96 * 2**20, cap * 3 // 4)))
    return Bt, nb, B_pad, vmem_limit


# ----------------------------------------------------------------------------
# Forward pass wrapper
# ----------------------------------------------------------------------------
def cnn_model_forward(x, params):
    # Attention projection params (w1, b1, w2, b2) are accepted for API parity but
    # unused: softmax over the length-1 sequence makes the attention an identity.
    wk, bconv, _w1, _b1, _w2, _b2, wfc, bfc = params
    B, L, Cin = x.shape
    assert L % 2 == 0, "MaxPool1d(2) expects an even sequence length"
    H = wk.shape[2]
    Lp = L // 2
    O = wfc.shape[1]

    Bt, nb, B_pad, vmem_limit = _choose_tiling(B, L, Cin, H, O)

    xf = x.astype(jnp.float32)
    if B_pad > B:
        xf = jnp.concatenate(
            [xf, jnp.zeros((B_pad - B, L, Cin), jnp.float32)], axis=0)

    # Time-major row ordering inside each batch tile (row = t*Bt + b): the kernel's
    # pool reads become contiguous aligned sublane slices and the conv-tap rolls
    # never cross batch elements.
    x_tm = xf.reshape(nb, Bt, L, Cin).transpose(0, 2, 1, 3).reshape(nb * L * Bt, Cin)

    # PyTorch flattens conv_out (B, H, Lp) channel-major (feature = h*Lp + t); fold
    # that permutation into the fc weight once instead of transposing activations.
    wfc3 = wfc.reshape(H, Lp, O).transpose(1, 0, 2)          # (Lp, H, O)

    out = pl.pallas_call(
        fused_cnn_kernel,
        out_shape=jax.ShapeDtypeStruct((B_pad, O), jnp.float32),
        grid_spec=pltpu.PrefetchScalarGridSpec(
            num_scalar_prefetch=0,
            grid=(nb,),
            in_specs=[
                pl.BlockSpec((L * Bt, Cin), lambda i: (i, 0)),    # x, time-major tile
                pl.BlockSpec((3, Cin, H), lambda i: (0, 0, 0)),   # conv weight
                pl.BlockSpec((1, H), lambda i: (0, 0)),           # conv bias
                pl.BlockSpec((Lp, H, O), lambda i: (0, 0, 0)),    # fc weight (permuted)
                pl.BlockSpec((1, O), lambda i: (0, 0)),           # fc bias
            ],
            out_specs=pl.BlockSpec((Bt, O), lambda i: (i, 0)),
            scratch_shapes=[
                pltpu.VMEM((L * Bt, H), jnp.float32),             # ReLU'd conv
            ],
        ),
        compiler_params=pltpu.CompilerParams(
            dimension_semantics=("parallel",),
            vmem_limit_bytes=vmem_limit,
        ),
    )(x_tm, wk.astype(jnp.float32), bconv.astype(jnp.float32),
      wfc3.astype(jnp.float32), bfc.astype(jnp.float32))

    return out[:B]


# ----------------------------------------------------------------------------
# Pure-JAX reference (includes the full attention math) for a correctness check
# ----------------------------------------------------------------------------
def reference_forward(x, params):
    wk, bconv, w1, b1, w2, b2, wfc, bfc = params
    B, L, _ = x.shape
    xpad = jnp.pad(x, ((0, 0), (1, 1), (0, 0)))
    conv = (xpad[:, 0:L] @ wk[0] + xpad[:, 1:L + 1] @ wk[1]
            + xpad[:, 2:L + 2] @ wk[2] + bconv)
    conv = jnp.maximum(conv, 0.0)                                     # (B, L, H)
    pooled = jnp.max(conv.reshape(B, L // 2, 2, -1), axis=2)          # (B, L//2, H)
    features = jnp.transpose(pooled, (0, 2, 1)).reshape(B, -1)        # channel-major
    energy = jnp.maximum(features @ w1 + b1, 0.0) @ w2 + b2           # (B, 1)
    weights = jax.nn.softmax(energy, axis=1)                          # exactly ones
    attended = features * weights
    return attended @ wfc + bfc


if __name__ == "__main__":
    B, L, Cin, H, O = 2, 16, 4, 8, 10
    fc_dim = H * (L // 2)

    key = jax.random.PRNGKey(0)
    ks = jax.random.split(key, 9)
    x = jax.random.normal(ks[0], (B, L, Cin), jnp.float32)
    # Deterministic synthetic parameters (shapes follow CNNModel.__init__):
    wk = jax.random.normal(ks[1], (3, Cin, H), jnp.float32) * 0.2   # Conv1d weight (tap-major)
    bconv = jax.random.normal(ks[2], (1, H), jnp.float32) * 0.1     # Conv1d bias
    w1 = jax.random.normal(ks[3], (fc_dim, 64), jnp.float32) * 0.1  # attention Linear 1 (dead)
    b1 = jax.random.normal(ks[4], (1, 64), jnp.float32) * 0.1
    w2 = jax.random.normal(ks[5], (64, 1), jnp.float32) * 0.1       # attention Linear 2 (dead)
    b2 = jax.random.normal(ks[6], (1, 1), jnp.float32) * 0.1
    wfc = jax.random.normal(ks[7], (fc_dim, O), jnp.float32) * 0.1  # final fc
    bfc = jax.random.normal(ks[8], (1, O), jnp.float32) * 0.1
    params = (wk, bconv, w1, b1, w2, b2, wfc, bfc)

    fwd = jax.jit(cnn_model_forward)
    out = jax.block_until_ready(fwd(x, params))
    ref = reference_forward(x, params)
    assert out.shape == (B, O), out.shape
    assert jnp.allclose(out, ref, atol=1e-4, rtol=1e-4), (out, ref)
    print("KERNEL_OK")
</pallas_src>

<mosaic_0001>
module attributes {stable_mosaic.version = 11 : i64} {
  func.func @fused_cnn_kernel(%arg0: i32, %arg1: memref<128x4xf32, #tpu.memory_space<vmem>>, %arg2: memref<3x4x8xf32, #tpu.memory_space<vmem>>, %arg3: memref<1x8xf32, #tpu.memory_space<vmem>>, %arg4: memref<8x8x10xf32, #tpu.memory_space<vmem>>, %arg5: memref<1x10xf32, #tpu.memory_space<vmem>>, %arg6: memref<8x10xf32, #tpu.memory_space<vmem>>, %arg7: memref<128x8xf32, #tpu.memory_space<vmem>>) attributes {dimension_semantics = [#tpu.dimension_semantics<parallel>], iteration_bounds = array<i64: 1>, scalar_prefetch = 0 : i64, scratch_operands = 1 : i64, tpu.core_type = #tpu.core_type<tc>, window_params = [{transform_indices = @transform_0, window_bounds = array<i64: 128, 4>}, {pipeline_mode = #tpu.pipeline_mode<synchronous>, transform_indices = @transform_1, window_bounds = array<i64: 3, 4, 8>}, {pipeline_mode = #tpu.pipeline_mode<synchronous>, transform_indices = @transform_2, window_bounds = array<i64: 1, 8>}, {pipeline_mode = #tpu.pipeline_mode<synchronous>, transform_indices = @transform_3, window_bounds = array<i64: 8, 8, 10>}, {pipeline_mode = #tpu.pipeline_mode<synchronous>, transform_indices = @transform_4, window_bounds = array<i64: 1, 10>}, {transform_indices = @transform_5, window_bounds = array<i64: 8, 10>}]} {
    %c0 = arith.constant 0 : index
    %c0_0 = arith.constant 0 : index
    %0 = vector.load %arg1[%c0, %c0_0] : memref<128x4xf32, #tpu.memory_space<vmem>>, vector<128x4xf32>
    %1 = tpu.iota {dimensions = array<i32: 0>} : vector<128x1xi32>
    %c8_i32 = arith.constant 8 : i32
    %2 = vector.broadcast %c8_i32 : i32 to vector<128x1xi32>
    %3 = arith.cmpi sge, %1, %2 : vector<128x1xi32>
    %4 = arith.extui %3 : vector<128x1xi1> to vector<128x1xi32>
    %5 = arith.sitofp %4 : vector<128x1xi32> to vector<128x1xf32>
    %c120_i32 = arith.constant 120 : i32
    %6 = vector.broadcast %c120_i32 : i32 to vector<128x1xi32>
    %7 = arith.cmpi slt, %1, %6 : vector<128x1xi32>
    %8 = arith.extui %7 : vector<128x1xi1> to vector<128x1xi32>
    %9 = arith.sitofp %8 : vector<128x1xi32> to vector<128x1xf32>
    %c8_i32_1 = arith.constant 8 : i32
    %10 = tpu.dynamic_rotate %0 by %c8_i32_1 dim 0 : vector<128x4xf32>, i32 -> vector<128x4xf32>
    %11 = vector.broadcast %5 : vector<128x1xf32> to vector<128x4xf32>
    %12 = arith.mulf %10, %11 : vector<128x4xf32>
    %c120_i32_2 = arith.constant 120 : i32
    %13 = tpu.dynamic_rotate %0 by %c120_i32_2 dim 0 : vector<128x4xf32>, i32 -> vector<128x4xf32>
    %14 = vector.broadcast %9 : vector<128x1xf32> to vector<128x4xf32>
    %15 = arith.mulf %13, %14 : vector<128x4xf32>
    %c0_3 = arith.constant 0 : index
    %c0_4 = arith.constant 0 : index
    %c0_5 = arith.constant 0 : index
    %16 = vector.load %arg2[%c0_3, %c0_4, %c0_5] : memref<3x4x8xf32, #tpu.memory_space<vmem>>, vector<1x4x8xf32>
    %17 = vector.shape_cast %16 : vector<1x4x8xf32> to vector<4x8xf32>
    %cst = arith.constant dense<0.000000e+00> : vector<128x8xf32>
    %18 = tpu.matmul %12, %17, %cst {dimension_numbers = #tpu.dot_dimension_numbers<[1], [0], [0], [1], [0, 0, 1, 1], [], []>} : vector<128x4xf32>, vector<4x8xf32>, vector<128x8xf32> -> vector<128x8xf32>
    %c1 = arith.constant 1 : index
    %c0_6 = arith.constant 0 : index
    %c0_7 = arith.constant 0 : index
    %19 = vector.load %arg2[%c1, %c0_6, %c0_7] : memref<3x4x8xf32, #tpu.memory_space<vmem>>, vector<1x4x8xf32>
    %20 = vector.shape_cast %19 : vector<1x4x8xf32> to vector<4x8xf32>
    %cst_8 = arith.constant dense<0.000000e+00> : vector<128x8xf32>
    %21 = tpu.matmul %0, %20, %cst_8 {dimension_numbers = #tpu.dot_dimension_numbers<[1], [0], [0], [1], [0, 0, 1, 1], [], []>} : vector<128x4xf32>, vector<4x8xf32>, vector<128x8xf32> -> vector<128x8xf32>
    %22 = arith.addf %18, %21 : vector<128x8xf32>
    %c2 = arith.constant 2 : index
    %c0_9 = arith.constant 0 : index
    %c0_10 = arith.constant 0 : index
    %23 = vector.load %arg2[%c2, %c0_9, %c0_10] : memref<3x4x8xf32, #tpu.memory_space<vmem>>, vector<1x4x8xf32>
    %24 = vector.shape_cast %23 : vector<1x4x8xf32> to vector<4x8xf32>
    %cst_11 = arith.constant dense<0.000000e+00> : vector<128x8xf32>
    %25 = tpu.matmul %15, %24, %cst_11 {dimension_numbers = #tpu.dot_dimension_numbers<[1], [0], [0], [1], [0, 0, 1, 1], [], []>} : vector<128x4xf32>, vector<4x8xf32>, vector<128x8xf32> -> vector<128x8xf32>
    %26 = arith.addf %22, %25 : vector<128x8xf32>
    %c0_12 = arith.constant 0 : index
    %c0_13 = arith.constant 0 : index
    %27 = vector.load %arg3[%c0_12, %c0_13] : memref<1x8xf32, #tpu.memory_space<vmem>>, vector<1x8xf32>
    %28 = vector.broadcast %27 : vector<1x8xf32> to vector<128x8xf32>
    %29 = arith.addf %26, %28 : vector<128x8xf32>
    %cst_14 = arith.constant 0.000000e+00 : f32
    %30 = vector.broadcast %cst_14 : f32 to vector<128x8xf32>
    %31 = arith.maximumf %29, %30 : vector<128x8xf32>
    %c0_15 = arith.constant 0 : index
    %c0_16 = arith.constant 0 : index
    %32 = vector.load %arg7[%c0_15, %c0_16] : memref<128x8xf32, #tpu.memory_space<vmem>>, vector<128x8xf32>
    tpu.vector_store %arg7[%c0_15, %c0_16], %31 {strides = array<i32>} : memref<128x8xf32, #tpu.memory_space<vmem>>, vector<128x8xf32>,
    %cst_17 = arith.constant 0.000000e+00 : f32
    %33 = vector.broadcast %cst_17 : f32 to vector<8x10xf32>
    %c0_i32 = arith.constant 0 : i32
    %c2_i32 = arith.constant 2 : i32
    %34 = arith.muli %c2_i32, %c0_i32 : i32
    %c8_i32_18 = arith.constant 8 : i32
    %35 = arith.muli %34, %c8_i32_18 : i32
    %36 = tpu.assume_multiple %35, 8 : i32
    %37 = arith.index_cast %36 : i32 to index
    %c0_19 = arith.constant 0 : index
    %38 = vector.load %arg7[%37, %c0_19] : memref<128x8xf32, #tpu.memory_space<vmem>>, vector<8x8xf32>
    %c8_i32_20 = arith.constant 8 : i32
    %39 = arith.addi %36, %c8_i32_20 : i32
    %40 = arith.index_cast %39 : i32 to index
    %c0_21 = arith.constant 0 : index
    %41 = vector.load %arg7[%40, %c0_21] : memref<128x8xf32, #tpu.memory_space<vmem>>, vector<8x8xf32>
    %42 = arith.maximumf %38, %41 : vector<8x8xf32>
    %43 = arith.index_cast %c0_i32 : i32 to index
    %c0_22 = arith.constant 0 : index
    %c0_23 = arith.constant 0 : index
    %44 = vector.load %arg4[%43, %c0_22, %c0_23] : memref<8x8x10xf32, #tpu.memory_space<vmem>>, vector<1x8x10xf32>
    %45 = vector.shape_cast %44 : vector<1x8x10xf32> to vector<8x10xf32>
    %cst_24 = arith.constant dense<0.000000e+00> : vector<8x10xf32>
    %46 = tpu.matmul %42, %45, %cst_24 {dimension_numbers = #tpu.dot_dimension_numbers<[1], [0], [0], [1], [0, 0, 1, 1], [], []>} : vector<8x8xf32>, vector<8x10xf32>, vector<8x10xf32> -> vector<8x10xf32>
    %47 = arith.addf %33, %46 : vector<8x10xf32>
    %c1_i32 = arith.constant 1 : i32
    %c2_i32_25 = arith.constant 2 : i32
    %48 = arith.muli %c2_i32_25, %c1_i32 : i32
    %c8_i32_26 = arith.constant 8 : i32
    %49 = arith.muli %48, %c8_i32_26 : i32
    %50 = tpu.assume_multiple %49, 8 : i32
    %51 = arith.index_cast %50 : i32 to index
    %c0_27 = arith.constant 0 : index
    %52 = vector.load %arg7[%51, %c0_27] : memref<128x8xf32, #tpu.memory_space<vmem>>, vector<8x8xf32>
    %c8_i32_28 = arith.constant 8 : i32
    %53 = arith.addi %50, %c8_i32_28 : i32
    %54 = arith.index_cast %53 : i32 to index
    %c0_29 = arith.constant 0 : index
    %55 = vector.load %arg7[%54, %c0_29] : memref<128x8xf32, #tpu.memory_space<vmem>>, vector<8x8xf32>
    %56 = arith.maximumf %52, %55 : vector<8x8xf32>
    %57 = arith.index_cast %c1_i32 : i32 to index
    %c0_30 = arith.constant 0 : index
    %c0_31 = arith.constant 0 : index
    %58 = vector.load %arg4[%57, %c0_30, %c0_31] : memref<8x8x10xf32, #tpu.memory_space<vmem>>, vector<1x8x10xf32>
    %59 = vector.shape_cast %58 : vector<1x8x10xf32> to vector<8x10xf32>
    %cst_32 = arith.constant dense<0.000000e+00> : vector<8x10xf32>
    %60 = tpu.matmul %56, %59, %cst_32 {dimension_numbers = #tpu.dot_dimension_numbers<[1], [0], [0], [1], [0, 0, 1, 1], [], []>} : vector<8x8xf32>, vector<8x10xf32>, vector<8x10xf32> -> vector<8x10xf32>
    %61 = arith.addf %47, %60 : vector<8x10xf32>
    %c2_i32_33 = arith.constant 2 : i32
    %c2_i32_34 = arith.constant 2 : i32
    %62 = arith.muli %c2_i32_34, %c2_i32_33 : i32
    %c8_i32_35 = arith.constant 8 : i32
    %63 = arith.muli %62, %c8_i32_35 : i32
    %64 = tpu.assume_multiple %63, 8 : i32
    %65 = arith.index_cast %64 : i32 to index
    %c0_36 = arith.constant 0 : index
    %66 = vector.load %arg7[%65, %c0_36] : memref<128x8xf32, #tpu.memory_space<vmem>>, vector<8x8xf32>
    %c8_i32_37 = arith.constant 8 : i32
    %67 = arith.addi %64, %c8_i32_37 : i32
    %68 = arith.index_cast %67 : i32 to index
    %c0_38 = arith.constant 0 : index
    %69 = vector.load %arg7[%68, %c0_38] : memref<128x8xf32, #tpu.memory_space<vmem>>, vector<8x8xf32>
    %70 = arith.maximumf %66, %69 : vector<8x8xf32>
    %71 = arith.index_cast %c2_i32_33 : i32 to index
    %c0_39 = arith.constant 0 : index
    %c0_40 = arith.constant 0 : index
    %72 = vector.load %arg4[%71, %c0_39, %c0_40] : memref<8x8x10xf32, #tpu.memory_space<vmem>>, vector<1x8x10xf32>
    %73 = vector.shape_cast %72 : vector<1x8x10xf32> to vector<8x10xf32>
    %cst_41 = arith.constant dense<0.000000e+00> : vector<8x10xf32>
    %74 = tpu.matmul %70, %73, %cst_41 {dimension_numbers = #tpu.dot_dimension_numbers<[1], [0], [0], [1], [0, 0, 1, 1], [], []>} : vector<8x8xf32>, vector<8x10xf32>, vector<8x10xf32> -> vector<8x10xf32>
    %75 = arith.addf %61, %74 : vector<8x10xf32>
    %c3_i32 = arith.constant 3 : i32
    %c2_i32_42 = arith.constant 2 : i32
    %76 = arith.muli %c2_i32_42, %c3_i32 : i32
    %c8_i32_43 = arith.constant 8 : i32
    %77 = arith.muli %76, %c8_i32_43 : i32
    %78 = tpu.assume_multiple %77, 8 : i32
    %79 = arith.index_cast %78 : i32 to index
    %c0_44 = arith.constant 0 : index
    %80 = vector.load %arg7[%79, %c0_44] : memref<128x8xf32, #tpu.memory_space<vmem>>, vector<8x8xf32>
    %c8_i32_45 = arith.constant 8 : i32
    %81 = arith.addi %78, %c8_i32_45 : i32
    %82 = arith.index_cast %81 : i32 to index
    %c0_46 = arith.constant 0 : index
    %83 = vector.load %arg7[%82, %c0_46] : memref<128x8xf32, #tpu.memory_space<vmem>>, vector<8x8xf32>
    %84 = arith.maximumf %80, %83 : vector<8x8xf32>
    %85 = arith.index_cast %c3_i32 : i32 to index
    %c0_47 = arith.constant 0 : index
    %c0_48 = arith.constant 0 : index
    %86 = vector.load %arg4[%85, %c0_47, %c0_48] : memref<8x8x10xf32, #tpu.memory_space<vmem>>, vector<1x8x10xf32>
    %87 = vector.shape_cast %86 : vector<1x8x10xf32> to vector<8x10xf32>
    %cst_49 = arith.constant dense<0.000000e+00> : vector<8x10xf32>
    %88 = tpu.matmul %84, %87, %cst_49 {dimension_numbers = #tpu.dot_dimension_numbers<[1], [0], [0], [1], [0, 0, 1, 1], [], []>} : vector<8x8xf32>, vector<8x10xf32>, vector<8x10xf32> -> vector<8x10xf32>
    %89 = arith.addf %75, %88 : vector<8x10xf32>
    %c4_i32 = arith.constant 4 : i32
    %c2_i32_50 = arith.constant 2 : i32
    %90 = arith.muli %c2_i32_50, %c4_i32 : i32
    %c8_i32_51 = arith.constant 8 : i32
    %91 = arith.muli %90, %c8_i32_51 : i32
    %92 = tpu.assume_multiple %91, 8 : i32
    %93 = arith.index_cast %92 : i32 to index
    %c0_52 = arith.constant 0 : index
    %94 = vector.load %arg7[%93, %c0_52] : memref<128x8xf32, #tpu.memory_space<vmem>>, vector<8x8xf32>
    %c8_i32_53 = arith.constant 8 : i32
    %95 = arith.addi %92, %c8_i32_53 : i32
    %96 = arith.index_cast %95 : i32 to index
    %c0_54 = arith.constant 0 : index
    %97 = vector.load %arg7[%96, %c0_54] : memref<128x8xf32, #tpu.memory_space<vmem>>, vector<8x8xf32>
    %98 = arith.maximumf %94, %97 : vector<8x8xf32>
    %99 = arith.index_cast %c4_i32 : i32 to index
    %c0_55 = arith.constant 0 : index
    %c0_56 = arith.constant 0 : index
    %100 = vector.load %arg4[%99, %c0_55, %c0_56] : memref<8x8x10xf32, #tpu.memory_space<vmem>>, vector<1x8x10xf32>
    %101 = vector.shape_cast %100 : vector<1x8x10xf32> to vector<8x10xf32>
    %cst_57 = arith.constant dense<0.000000e+00> : vector<8x10xf32>
    %102 = tpu.matmul %98, %101, %cst_57 {dimension_numbers = #tpu.dot_dimension_numbers<[1], [0], [0], [1], [0, 0, 1, 1], [], []>} : vector<8x8xf32>, vector<8x10xf32>, vector<8x10xf32> -> vector<8x10xf32>
    %103 = arith.addf %89, %102 : vector<8x10xf32>
    %c5_i32 = arith.constant 5 : i32
    %c2_i32_58 = arith.constant 2 : i32
    %104 = arith.muli %c2_i32_58, %c5_i32 : i32
    %c8_i32_59 = arith.constant 8 : i32
    %105 = arith.muli %104, %c8_i32_59 : i32
    %106 = tpu.assume_multiple %105, 8 : i32
    %107 = arith.index_cast %106 : i32 to index
    %c0_60 = arith.constant 0 : index
    %108 = vector.load %arg7[%107, %c0_60] : memref<128x8xf32, #tpu.memory_space<vmem>>, vector<8x8xf32>
    %c8_i32_61 = arith.constant 8 : i32
    %109 = arith.addi %106, %c8_i32_61 : i32
    %110 = arith.index_cast %109 : i32 to index
    %c0_62 = arith.constant 0 : index
    %111 = vector.load %arg7[%110, %c0_62] : memref<128x8xf32, #tpu.memory_space<vmem>>, vector<8x8xf32>
    %112 = arith.maximumf %108, %111 : vector<8x8xf32>
    %113 = arith.index_cast %c5_i32 : i32 to index
    %c0_63 = arith.constant 0 : index
    %c0_64 = arith.constant 0 : index
    %114 = vector.load %arg4[%113, %c0_63, %c0_64] : memref<8x8x10xf32, #tpu.memory_space<vmem>>, vector<1x8x10xf32>
    %115 = vector.shape_cast %114 : vector<1x8x10xf32> to vector<8x10xf32>
    %cst_65 = arith.constant dense<0.000000e+00> : vector<8x10xf32>
    %116 = tpu.matmul %112, %115, %cst_65 {dimension_numbers = #tpu.dot_dimension_numbers<[1], [0], [0], [1], [0, 0, 1, 1], [], []>} : vector<8x8xf32>, vector<8x10xf32>, vector<8x10xf32> -> vector<8x10xf32>
    %117 = arith.addf %103, %116 : vector<8x10xf32>
    %c6_i32 = arith.constant 6 : i32
    %c2_i32_66 = arith.constant 2 : i32
    %118 = arith.muli %c2_i32_66, %c6_i32 : i32
    %c8_i32_67 = arith.constant 8 : i32
    %119 = arith.muli %118, %c8_i32_67 : i32
    %120 = tpu.assume_multiple %119, 8 : i32
    %121 = arith.index_cast %120 : i32 to index
    %c0_68 = arith.constant 0 : index
    %122 = vector.load %arg7[%121, %c0_68] : memref<128x8xf32, #tpu.memory_space<vmem>>, vector<8x8xf32>
    %c8_i32_69 = arith.constant 8 : i32
    %123 = arith.addi %120, %c8_i32_69 : i32
    %124 = arith.index_cast %123 : i32 to index
    %c0_70 = arith.constant 0 : index
    %125 = vector.load %arg7[%124, %c0_70] : memref<128x8xf32, #tpu.memory_space<vmem>>, vector<8x8xf32>
    %126 = arith.maximumf %122, %125 : vector<8x8xf32>
    %127 = arith.index_cast %c6_i32 : i32 to index
    %c0_71 = arith.constant 0 : index
    %c0_72 = arith.constant 0 : index
    %128 = vector.load %arg4[%127, %c0_71, %c0_72] : memref<8x8x10xf32, #tpu.memory_space<vmem>>, vector<1x8x10xf32>
    %129 = vector.shape_cast %128 : vector<1x8x10xf32> to vector<8x10xf32>
    %cst_73 = arith.constant dense<0.000000e+00> : vector<8x10xf32>
    %130 = tpu.matmul %126, %129, %cst_73 {dimension_numbers = #tpu.dot_dimension_numbers<[1], [0], [0], [1], [0, 0, 1, 1], [], []>} : vector<8x8xf32>, vector<8x10xf32>, vector<8x10xf32> -> vector<8x10xf32>
    %131 = arith.addf %117, %130 : vector<8x10xf32>
    %c7_i32 = arith.constant 7 : i32
    %c2_i32_74 = arith.constant 2 : i32
    %132 = arith.muli %c2_i32_74, %c7_i32 : i32
    %c8_i32_75 = arith.constant 8 : i32
    %133 = arith.muli %132, %c8_i32_75 : i32
    %134 = tpu.assume_multiple %133, 8 : i32
    %135 = arith.index_cast %134 : i32 to index
    %c0_76 = arith.constant 0 : index
    %136 = vector.load %arg7[%135, %c0_76] : memref<128x8xf32, #tpu.memory_space<vmem>>, vector<8x8xf32>
    %c8_i32_77 = arith.constant 8 : i32
    %137 = arith.addi %134, %c8_i32_77 : i32
    %138 = arith.index_cast %137 : i32 to index
    %c0_78 = arith.constant 0 : index
    %139 = vector.load %arg7[%138, %c0_78] : memref<128x8xf32, #tpu.memory_space<vmem>>, vector<8x8xf32>
    %140 = arith.maximumf %136, %139 : vector<8x8xf32>
    %141 = arith.index_cast %c7_i32 : i32 to index
    %c0_79 = arith.constant 0 : index
    %c0_80 = arith.constant 0 : index
    %142 = vector.load %arg4[%141, %c0_79, %c0_80] : memref<8x8x10xf32, #tpu.memory_space<vmem>>, vector<1x8x10xf32>
    %143 = vector.shape_cast %142 : vector<1x8x10xf32> to vector<8x10xf32>
    %cst_81 = arith.constant dense<0.000000e+00> : vector<8x10xf32>
    %144 = tpu.matmul %140, %143, %cst_81 {dimension_numbers = #tpu.dot_dimension_numbers<[1], [0], [0], [1], [0, 0, 1, 1], [], []>} : vector<8x8xf32>, vector<8x10xf32>, vector<8x10xf32> -> vector<8x10xf32>
    %145 = arith.addf %131, %144 : vector<8x10xf32>
    %c8_i32_82 = arith.constant 8 : i32
    %c0_83 = arith.constant 0 : index
    %c0_84 = arith.constant 0 : index
    %146 = vector.load %arg5[%c0_83, %c0_84] : memref<1x10xf32, #tpu.memory_space<vmem>>, vector<1x10xf32>
    %147 = vector.broadcast %146 : vector<1x10xf32> to vector<8x10xf32>
    %148 = arith.addf %145, %147 : vector<8x10xf32>
    %c0_85 = arith.constant 0 : index
    %c0_86 = arith.constant 0 : index
    %149 = vector.load %arg6[%c0_85, %c0_86] : memref<8x10xf32, #tpu.memory_space<vmem>>, vector<8x10xf32>
    tpu.vector_store %arg6[%c0_85, %c0_86], %148 {strides = array<i32>} : memref<8x10xf32, #tpu.memory_space<vmem>>, vector<8x10xf32>,
    return
  }
  func.func @transform_0(%arg0: i32) -> (i32, i32) {
    %c0_i32 = arith.constant 0 : i32
    %c0_i32_0 = arith.constant 0 : i32
    return %arg0, %c0_i32 : i32, i32
  }
  func.func @transform_1(%arg0: i32) -> (i32, i32, i32) {
    %c0_i32 = arith.constant 0 : i32
    %c0_i32_0 = arith.constant 0 : i32
    %c0_i32_1 = arith.constant 0 : i32
    %c0_i32_2 = arith.constant 0 : i32
    return %c0_i32, %c0_i32_0, %c0_i32_1 : i32, i32, i32
  }
  func.func @transform_2(%arg0: i32) -> (i32, i32) {
    %c0_i32 = arith.constant 0 : i32
    %c0_i32_0 = arith.constant 0 : i32
    %c0_i32_1 = arith.constant 0 : i32
    return %c0_i32, %c0_i32_0 : i32, i32
  }
  func.func @transform_3(%arg0: i32) -> (i32, i32, i32) {
    %c0_i32 = arith.constant 0 : i32
    %c0_i32_0 = arith.constant 0 : i32
    %c0_i32_1 = arith.constant 0 : i32
    %c0_i32_2 = arith.constant 0 : i32
    return %c0_i32, %c0_i32_0, %c0_i32_1 : i32, i32, i32
  }
  func.func @transform_4(%arg0: i32) -> (i32, i32) {
    %c0_i32 = arith.constant 0 : i32
    %c0_i32_0 = arith.constant 0 : i32
    %c0_i32_1 = arith.constant 0 : i32
    return %c0_i32, %c0_i32_0 : i32, i32
  }
  func.func @transform_5(%arg0: i32) -> (i32, i32) {
    %c0_i32 = arith.constant 0 : i32
    %c0_i32_0 = arith.constant 0 : i32
    return %arg0, %c0_i32 : i32, i32
  }
}

</mosaic_0001>

<bundles_post_ra>
// kernel: cnn_model_forward.1
= control target key start
LH: loop header
LB: loop body
LE: loop exit
PB: predicated region body
PF: predicated region fallthrough
CT: control target
= control target key end

     0   :  { %vm233_vm0 = vcmask 1043456   ;;  %vm184_vm1 = vcmask 31744   ;;  %vm588_vm2 = vcmask 64512   ;;  %vm862_vm3 = vcmask 80896   ;;  %s1165_s1 = inlined_call_operand.vmem [shape: f32[3,4,8], index: 1, kind: input, shape index: {}]   ;;  %s1166_s0 = inlined_call_operand.vmem [shape: f32[128,4], index: 0, kind: input, shape index: {}]   ;;  %s1167_s2 = inlined_call_operand.vmem [shape: f32[1,8], index: 2, kind: input, shape index: {}]   ;;  %s1168_s3 = inlined_call_operand.vmem [shape: f32[8,8,10], index: 3, kind: input, shape index: {}]   ;;  %s1169_s4 = inlined_call_operand.vmem [shape: f32[1,10], index: 4, kind: input, shape index: {}]   ;;  %s1170_s5 = inlined_call_operand.vmem [shape: f32[8,10], index: 5, kind: output, shape index: {}]  }
   0x1   :  { %v911_v0 = vld [vmem:[%s1165_s1 + $0x8] sm:$0xf]  ;;  %v876_v2 = vld [vmem:[%s1165_s1 + $0x4] sm:$0xf]  ;;  %v181_v3 = vld [vmem:[%s1165_s1] sm:$0xf] }
   0x2   :  { %v21_v1 = vld [vmem:[%s1166_s0 + $0x8] sm:$0xff]  ;;  %912 = vmatpush.msk.msra.mxu2 %vm233_vm0, %v911_v0  ;;  %877 = vmatpush.msk.msra.mxu0 %vm233_vm0, %v876_v2  ;;  %v20_v4 = vld [vmem:[%s1166_s0] sm:$0xff]  ;;  %v35_v5 = vld [vmem:[%s1166_s0 + $0x78] sm:$0xff] }
   0x3   :  { %913 = vmatmul.msk.f32.vlgmr.msra.gmra.mxu2 %vm184_vm1, %v21_v1  ;;  %894 = vmatpush.msk.msra.mxu1 %vm233_vm0, %v181_v3  ;;  %v149_v6 = vmul.f32 0.0, %v35_v5  ;;  %v34_v7 = vld [vmem:[%s1166_s0 + $0x70] sm:$0xff]  ;;  %v23_v9 = vld [vmem:[%s1166_s0 + $0x18] sm:$0xff]  ;;  %v33_v10 = vld [vmem:[%s1166_s0 + $0x68] sm:$0xff]  ;;  %v180_v14 = vmul.f32 0.0, %v20_v4 }
   0x4   :  { %878 = vmatmul.msk.f32.vlgmr.msra.gmra.mxu0 %vm184_vm1, %v20_v4  ;;  %944 = vmatpush.msk.msra.mxu3 %vm233_vm0, %v876_v2  ;;  %v22_v8 = vld [vmem:[%s1166_s0 + $0x10] sm:$0xff]  ;;  %v24_v11 = vld [vmem:[%s1166_s0 + $0x20] sm:$0xff]  ;;  %v25_v12 = vld [vmem:[%s1166_s0 + $0x28] sm:$0xff] }
   0x5   :  { %895 = vmatmul.msk.f32.vlgmr.msra.gmra.mxu1 %vm184_vm1, %v149_v6  ;;  %892 = vmatmul.msk.f32.vlgmr.msra.gmra.mxu3 %vm184_vm1, %v34_v7  ;;  %v26_v13 = vld [vmem:[%s1166_s0 + $0x30] sm:$0xff]  ;;  %v27_v15 = vld [vmem:[%s1166_s0 + $0x38] sm:$0xff]  ;;  %v28_v16 = vld [vmem:[%s1166_s0 + $0x40] sm:$0xff] }
   0x6   :  { %945 = vmatpush.msk.msrb.mxu3 %vm233_vm0, %v181_v3  ;;  %v29_v17 = vld [vmem:[%s1166_s0 + $0x48] sm:$0xff]  ;;  %v30_v18 = vld [vmem:[%s1166_s0 + $0x50] sm:$0xff]  ;;  %v31_v19 = vld [vmem:[%s1166_s0 + $0x58] sm:$0xff] }
   0x7   :  { %v32_v20 = vld [vmem:[%s1166_s0 + $0x60] sm:$0xff]  ;;  %v929_v33 = vld [vmem:[%s1168_s3 + $0x8] sm:$0xff] }
   0x8   :  { %946 = vmatpush.msk.msra.mxu3 %vm233_vm0, %v911_v0  ;;  %v1093_v24 = vld [vmem:[%s1167_s2] ss:$0 sm:$0xff] }
   0x9   :  { %v610_v42 = vld [vmem:[%s1168_s3] sm:$0xff] }
   0xb   :  { %914 = vmatmul.msk.f32.gmra.mxu2 %vm184_vm1, %v22_v8 }
   0xc   :  { %879 = vmatmul.msk.f32.gmra.mxu0 %vm184_vm1, %v21_v1 }
   0xd   :  { %896 = vmatmul.msk.f32.gmra.mxu1 %vm184_vm1, %v20_v4  ;;  %893 = vmatmul.msk.f32.gmra.mxu3 %vm184_vm1, %v35_v5 }
  0x13   :  { %915 = vmatmul.msk.f32.gmra.mxu2 %vm184_vm1, %v23_v9 }
  0x14   :  { %880 = vmatmul.msk.f32.gmra.mxu0 %vm184_vm1, %v22_v8 }
  0x15   :  { %897 = vmatmul.msk.f32.gmra.mxu1 %vm184_vm1, %v21_v1  ;;  %909 = vmatmul.msk.f32.vlgmr.msrb.gmra.mxu3 %vm184_vm1, %v33_v10 }
  0x16   :  { %637 = vmatpush.msrb.mxu3 %v929_v33 }
  0x1b   :  { %916 = vmatmul.msk.f32.gmra.mxu2 %vm184_vm1, %v24_v11 }
  0x1c   :  { %881 = vmatmul.msk.f32.gmra.mxu0 %vm184_vm1, %v23_v9 }
  0x1d   :  { %898 = vmatmul.msk.f32.gmra.mxu1 %vm184_vm1, %v22_v8  ;;  %910 = vmatmul.msk.f32.gmra.mxu3 %vm184_vm1, %v34_v7 }
  0x23   :  { %917 = vmatmul.msk.f32.gmra.mxu2 %vm184_vm1, %v25_v12 }
  0x24   :  { %882 = vmatmul.msk.f32.gmra.mxu0 %vm184_vm1, %v24_v11 }
  0x25   :  { %899 = vmatmul.msk.f32.gmra.mxu1 %vm184_vm1, %v23_v9  ;;  %927 = vmatmul.msk.f32.vlgmr.msra.gmra.mxu3 %vm184_vm1, %v35_v5 }
  0x26   :  { %660 = vmatpush.msra.mxu3 %v610_v42 }
  0x2b   :  { %918 = vmatmul.msk.f32.gmra.mxu2 %vm184_vm1, %v26_v13 }
  0x2c   :  { %883 = vmatmul.msk.f32.gmra.mxu0 %vm184_vm1, %v25_v12 }
  0x2d   :  { %900 = vmatmul.msk.f32.gmra.mxu1 %vm184_vm1, %v24_v11  ;;  %928 = vmatmul.msk.f32.gmra.mxu3 %vm184_vm1, %v180_v14 }
  0x33   :  { %919 = vmatmul.msk.f32.gmra.mxu2 %vm184_vm1, %v27_v15 }
  0x34   :  { %884 = vmatmul.msk.f32.gmra.mxu0 %vm184_vm1, %v26_v13 }
  0x35   :  { %901 = vmatmul.msk.f32.gmra.mxu1 %vm184_vm1, %v25_v12 }
  0x3b   :  { %920 = vmatmul.msk.f32.gmra.mxu2 %vm184_vm1, %v28_v16 }
  0x3c   :  { %885 = vmatmul.msk.f32.gmra.mxu0 %vm184_vm1, %v27_v15 }
  0x3d   :  { %902 = vmatmul.msk.f32.gmra.mxu1 %vm184_vm1, %v26_v13 }
  0x43   :  { %921 = vmatmul.msk.f32.gmra.mxu2 %vm184_vm1, %v29_v17 }
  0x44   :  { %886 = vmatmul.msk.f32.gmra.mxu0 %vm184_vm1, %v28_v16 }
  0x45   :  { %903 = vmatmul.msk.f32.gmra.mxu1 %vm184_vm1, %v27_v15 }
  0x4b   :  { %922 = vmatmul.msk.f32.gmra.mxu2 %vm184_vm1, %v30_v18 }
  0x4c   :  { %887 = vmatmul.msk.f32.gmra.mxu0 %vm184_vm1, %v29_v17 }
  0x4d   :  { %904 = vmatmul.msk.f32.gmra.mxu1 %vm184_vm1, %v28_v16 }
  0x53   :  { %923 = vmatmul.msk.f32.gmra.mxu2 %vm184_vm1, %v31_v19 }
  0x54   :  { %888 = vmatmul.msk.f32.gmra.mxu0 %vm184_vm1, %v30_v18 }
  0x55   :  { %905 = vmatmul.msk.f32.gmra.mxu1 %vm184_vm1, %v29_v17 }
  0x5b   :  { %924 = vmatmul.msk.f32.gmra.mxu2 %vm184_vm1, %v32_v20 }
  0x5c   :  { %889 = vmatmul.msk.f32.gmra.mxu0 %vm184_vm1, %v31_v19 }
  0x5d   :  { %906 = vmatmul.msk.f32.gmra.mxu1 %vm184_vm1, %v30_v18 }
  0x63   :  { %925 = vmatmul.msk.f32.gmra.mxu2 %vm184_vm1, %v33_v10 }
  0x64   :  { %890 = vmatmul.msk.f32.gmra.mxu0 %vm184_vm1, %v32_v20 }
  0x65   :  { %907 = vmatmul.msk.f32.gmra.mxu1 %vm184_vm1, %v31_v19 }
  0x6b   :  { %926 = vmatmul.msk.f32.gmra.mxu2 %vm184_vm1, %v34_v7  ;;  %v932_v7 = vld [vmem:[%s1168_s3 + $0x10] sm:$0xff] }
  0x6c   :  { %891 = vmatmul.msk.f32.gmra.mxu0 %vm184_vm1, %v33_v10 }
  0x6d   :  { %908 = vmatmul.msk.f32.gmra.mxu1 %vm184_vm1, %v32_v20 }
  0x81   :  { %v254_v21 = vpop.f32.mrf.mxu0 }
  0x82   :  { %v370_v22 = vpop.f32.mrf.mxu1 }
  0x83   :  { %v371_v23 = vadd.f32 %v370_v22, %v254_v21 }
  0x86   :  { %v488_v25 = vpop.f32.mrf.mxu2 }
  0x87   :  { %v536_v26 = vadd.f32 %v488_v25, %v371_v23 }
  0x88   :  { %v296_v27 = vpop.f32.mrf.mxu3 }
  0x89   :  { %v556_v28 = vadd.f32 %v1093_v24, %v536_v26  ;;  %v257_v29 = vpop.f32.mrf.mxu0  ;;  %v934_v26 = vld [vmem:[%s1168_s3 + $0x18] sm:$0xff] }
  0x8a   :  { %v373_v30 = vpop.f32.mrf.mxu1 }
  0x8b   :  { %v572_v31 = vmax.f32 %v556_v28, 0.0  ;;  %v374_v32 = vadd.f32 %v373_v30, %v257_v29 }
  0x8d   :  { %589 = vst.msk [vmem:[#allocation2] sm:$0xff] %vm588_vm2, %v572_v31 }
  0x8e   :  { %v491_v34 = vpop.f32.mrf.mxu2 }
  0x8f   :  { %v537_v35 = vadd.f32 %v491_v34, %v374_v32 }
  0x90   :  { %v299_v36 = vpop.f32.mrf.mxu3 }
  0x91   :  { %v557_v37 = vadd.f32 %v1093_v24, %v537_v35  ;;  %v260_v38 = vpop.f32.mrf.mxu0 }
  0x92   :  { %v376_v39 = vpop.f32.mrf.mxu1 }
  0x93   :  { %v573_v40 = vmax.f32 %v557_v37, 0.0  ;;  %v377_v41 = vadd.f32 %v376_v39, %v260_v38  ;;  %v936_v38 = vld [vmem:[%s1168_s3 + $0x20] sm:$0xff] }
  0x94   :  { %v605_v23 = vld [vmem:[#allocation2] sm:$0xff] }
  0x95   :  { %590 = vst.msk [vmem:[#allocation2 + $0x8] sm:$0xff] %vm588_vm2, %v573_v40 }
  0x96   :  { %v494_v43 = vpop.f32.mrf.mxu2 }
  0x97   :  { %v538_v44 = vadd.f32 %v494_v43, %v377_v41 }
  0x98   :  { %v412_v45 = vpop.f32.mrf.mxu3 }
  0x99   :  { %v558_v46 = vadd.f32 %v1093_v24, %v538_v44  ;;  %v263_v47 = vpop.f32.mrf.mxu0  ;;  %v413_v0 = vadd.f32 %v412_v45, %v296_v27 }
  0x9a   :  { %v379_v48 = vpop.f32.mrf.mxu1 }
  0x9b   :  { %v574_v49 = vmax.f32 %v558_v46, 0.0  ;;  %v380_v50 = vadd.f32 %v379_v48, %v263_v47 }
  0x9c   :  { %v608_v19 = vld [vmem:[#allocation2 + $0x8] sm:$0xff] }
  0x9d   :  { %591 = vst.msk [vmem:[#allocation2 + $0x10] sm:$0xff] %vm588_vm2, %v574_v49  ;;  %v609_v25 = vmax.f32 %v605_v23, %v608_v19 }
  0x9e   :  { %v497_v51 = vpop.f32.mrf.mxu2 }
  0x9f   :  { %v539_v52 = vadd.f32 %v497_v51, %v380_v50 }
  0xa0   :  { %v415_v53 = vpop.f32.mrf.mxu3 }
  0xa1   :  { %v559_v54 = vadd.f32 %v1093_v24, %v539_v52  ;;  %v266_v55 = vpop.f32.mrf.mxu0  ;;  %v416_v8 = vadd.f32 %v415_v53, %v299_v36 }
  0xa2   :  { %v382_v56 = vpop.f32.mrf.mxu1 }
  0xa3   :  { %v575_v57 = vmax.f32 %v559_v54, 0.0  ;;  %v383_v58 = vadd.f32 %v382_v56, %v266_v55  ;;  %v938_v56 = vld [vmem:[%s1168_s3 + $0x28] sm:$0xff] }
  0xa4   :  { %v612_v4 = vld [vmem:[#allocation2 + $0x10] sm:$0xff] }
  0xa5   :  { %592 = vst.msk [vmem:[#allocation2 + $0x18] sm:$0xff] %vm588_vm2, %v575_v57 }
  0xa6   :  { %v500_v59 = vpop.f32.mrf.mxu2 }
  0xa7   :  { %v540_v60 = vadd.f32 %v500_v59, %v383_v58 }
  0xa8   :  { %v530_v61 = vpop.f32.mrf.mxu3 }
  0xa9   :  { %v560_v62 = vadd.f32 %v1093_v24, %v540_v60  ;;  %v269_v63 = vpop.f32.mrf.mxu0  ;;  %v550_v9 = vadd.f32 %v530_v61, %v413_v0 }
  0xaa   :  { %v385_v1 = vpop.f32.mrf.mxu1 }
  0xab   :  { %v576_v2 = vmax.f32 %v560_v62, 0.0  ;;  %v386_v3 = vadd.f32 %v385_v1, %v269_v63  ;;  %v570_v12 = vadd.f32 %v1093_v24, %v550_v9 }
  0xac   :  { %v615_v5 = vld [vmem:[#allocation2 + $0x18] sm:$0xff] }
  0xad   :  { %593 = vst.msk [vmem:[#allocation2 + $0x20] sm:$0xff] %vm588_vm2, %v576_v2  ;;  %v616_v6 = vmax.f32 %v612_v4, %v615_v5  ;;  %v586_v16 = vmax.f32 %v570_v12, 0.0 }
  0xae   :  { %v503_v10 = vpop.f32.mrf.mxu2 }
  0xaf   :  { %v541_v11 = vadd.f32 %v503_v10, %v386_v3  ;;  %930 = vmatmul.msk.f32.vlgmr.msrb.gmra.mxu3 %vm588_vm2, %v616_v6  ;;  %603 = vst.msk [vmem:[#allocation2 + $0x70] sm:$0xff] %vm588_vm2, %v586_v16  ;;  %v940_v10 = vld [vmem:[%s1168_s3 + $0x30] sm:$0xff] }
  0xb0   :  { %691 = vmatpush.msrb.mxu3 %v932_v7  ;;  %v533_v13 = vpop.f32.mrf.mxu3 }
  0xb1   :  { %v561_v14 = vadd.f32 %v1093_v24, %v541_v11  ;;  %v272_v15 = vpop.f32.mrf.mxu0  ;;  %v551_v17 = vadd.f32 %v533_v13, %v416_v8 }
  0xb2   :  { %v388_v18 = vpop.f32.mrf.mxu1 }
  0xb3   :  { %v577_v20 = vmax.f32 %v561_v14, 0.0  ;;  %v389_v21 = vadd.f32 %v388_v18, %v272_v15  ;;  %v571_v22 = vadd.f32 %v1093_v24, %v551_v17 }
  0xb4   :  { %v666_v35 = vld [vmem:[#allocation2 + $0x20] sm:$0xff] }
  0xb5   :  { %594 = vst.msk [vmem:[#allocation2 + $0x28] sm:$0xff] %vm588_vm2, %v577_v20  ;;  %v587_v27 = vmax.f32 %v571_v22, 0.0 }
  0xb6   :  { %v506_v28 = vpop.f32.mrf.mxu2 }
  0xb7   :  { %v542_v29 = vadd.f32 %v506_v28, %v389_v21  ;;  %931 = vmatmul.msk.f32.vlgmr.msra.gmra.mxu3 %vm588_vm2, %v609_v25  ;;  %604 = vst.msk [vmem:[#allocation2 + $0x78] sm:$0xff] %vm588_vm2, %v587_v27 }
  0xb8   :  { %723 = vmatpush.msra.mxu3 %v934_v26 }
  0xb9   :  { %v562_v30 = vadd.f32 %v1093_v24, %v542_v29  ;;  %v275_v31 = vpop.f32.mrf.mxu0  ;;  %v942_v29 = vld [vmem:[%s1168_s3 + $0x38] sm:$0xff] }
  0xba   :  { %v391_v32 = vpop.f32.mrf.mxu1 }
  0xbb   :  { %v578_v33 = vmax.f32 %v562_v30, 0.0  ;;  %v392_v34 = vadd.f32 %v391_v32, %v275_v31 }
  0xbc   :  { %v669_v36 = vld [vmem:[#allocation2 + $0x28] sm:$0xff] }
  0xbd   :  { %595 = vst.msk [vmem:[#allocation2 + $0x30] sm:$0xff] %vm588_vm2, %v578_v33  ;;  %v670_v37 = vmax.f32 %v666_v35, %v669_v36 }
  0xbe   :  { %v509_v39 = vpop.f32.mrf.mxu2 }
  0xbf   :  { %v543_v40 = vadd.f32 %v509_v39, %v392_v34  ;;  %933 = vmatmul.msk.f32.vlgmr.msrb.gmra.mxu3 %vm588_vm2, %v670_v37  ;;  %v826_v37 = vld [vmem:[#allocation2 + $0x70] sm:$0xff] }
  0xc0   :  { %755 = vmatpush.msrb.mxu3 %v936_v38  ;;  %v829_v38 = vld [vmem:[#allocation2 + $0x78] sm:$0xff] }
  0xc1   :  { %v563_v41 = vadd.f32 %v1093_v24, %v543_v40  ;;  %v278_v42 = vpop.f32.mrf.mxu0  ;;  %v830_v39 = vmax.f32 %v826_v37, %v829_v38 }
  0xc2   :  { %v394_v43 = vpop.f32.mrf.mxu1 }
  0xc3   :  { %v579_v44 = vmax.f32 %v563_v41, 0.0  ;;  %v395_v45 = vadd.f32 %v394_v43, %v278_v42 }
  0xc4   :  { %v698_v53 = vld [vmem:[#allocation2 + $0x30] sm:$0xff] }
  0xc5   :  { %596 = vst.msk [vmem:[#allocation2 + $0x38] sm:$0xff] %vm588_vm2, %v579_v44 }
  0xc6   :  { %v512_v46 = vpop.f32.mrf.mxu2 }
  0xc7   :  { %v544_v47 = vadd.f32 %v512_v46, %v395_v45 }
  0xc9   :  { %v564_v48 = vadd.f32 %v1093_v24, %v544_v47  ;;  %v281_v49 = vpop.f32.mrf.mxu0 }
  0xca   :  { %v397_v50 = vpop.f32.mrf.mxu1 }
  0xcb   :  { %v580_v51 = vmax.f32 %v564_v48, 0.0  ;;  %v398_v52 = vadd.f32 %v397_v50, %v281_v49 }
  0xcc   :  { %v701_v54 = vld [vmem:[#allocation2 + $0x38] sm:$0xff] }
  0xcd   :  { %597 = vst.msk [vmem:[#allocation2 + $0x40] sm:$0xff] %vm588_vm2, %v580_v51  ;;  %v702_v55 = vmax.f32 %v698_v53, %v701_v54 }
  0xce   :  { %v515_v57 = vpop.f32.mrf.mxu2 }
  0xcf   :  { %v545_v58 = vadd.f32 %v515_v57, %v398_v52  ;;  %935 = vmatmul.msk.f32.vlgmr.msra.gmra.mxu3 %vm588_vm2, %v702_v55  ;;  %v948_v52 = vld [vmem:[%s1169_s4] ss:$0 sm:$0xff] }
  0xd0   :  { %787 = vmatpush.msra.mxu3 %v938_v56 }
  0xd1   :  { %v565_v59 = vadd.f32 %v1093_v24, %v545_v58  ;;  %v284_v60 = vpop.f32.mrf.mxu0 }
  0xd2   :  { %v400_v61 = vpop.f32.mrf.mxu1 }
  0xd3   :  { %v581_v62 = vmax.f32 %v565_v59, 0.0  ;;  %v401_v63 = vadd.f32 %v400_v61, %v284_v60 }
  0xd4   :  { %v730_v7 = vld [vmem:[#allocation2 + $0x40] sm:$0xff] }
  0xd5   :  { %598 = vst.msk [vmem:[#allocation2 + $0x48] sm:$0xff] %vm588_vm2, %v581_v62 }
  0xd6   :  { %v518_v0 = vpop.f32.mrf.mxu2 }
  0xd7   :  { %v546_v1 = vadd.f32 %v518_v0, %v401_v63 }
  0xd9   :  { %v566_v2 = vadd.f32 %v1093_v24, %v546_v1  ;;  %v287_v3 = vpop.f32.mrf.mxu0 }
  0xda   :  { %v403_v4 = vpop.f32.mrf.mxu1 }
  0xdb   :  { %v582_v5 = vmax.f32 %v566_v2, 0.0  ;;  %v404_v6 = vadd.f32 %v403_v4, %v287_v3 }
  0xdc   :  { %v733_v8 = vld [vmem:[#allocation2 + $0x48] sm:$0xff] }
  0xdd   :  { %599 = vst.msk [vmem:[#allocation2 + $0x50] sm:$0xff] %vm588_vm2, %v582_v5  ;;  %v734_v9 = vmax.f32 %v730_v7, %v733_v8 }
  0xde   :  { %v521_v11 = vpop.f32.mrf.mxu2 }
  0xdf   :  { %v547_v12 = vadd.f32 %v521_v11, %v404_v6  ;;  %937 = vmatmul.msk.f32.vlgmr.msrb.gmra.mxu3 %vm588_vm2, %v734_v9 }
  0xe0   :  { %819 = vmatpush.msrb.mxu3 %v940_v10 }
  0xe1   :  { %v567_v13 = vadd.f32 %v1093_v24, %v547_v12  ;;  %v290_v14 = vpop.f32.mrf.mxu0 }
  0xe2   :  { %v406_v15 = vpop.f32.mrf.mxu1 }
  0xe3   :  { %v583_v16 = vmax.f32 %v567_v13, 0.0  ;;  %v407_v17 = vadd.f32 %v406_v15, %v290_v14 }
  0xe4   :  { %v762_v26 = vld [vmem:[#allocation2 + $0x50] sm:$0xff] }
  0xe5   :  { %600 = vst.msk [vmem:[#allocation2 + $0x58] sm:$0xff] %vm588_vm2, %v583_v16 }
  0xe6   :  { %v524_v18 = vpop.f32.mrf.mxu2 }
  0xe7   :  { %v548_v19 = vadd.f32 %v524_v18, %v407_v17 }
  0xe9   :  { %v568_v20 = vadd.f32 %v1093_v24, %v548_v19  ;;  %v293_v21 = vpop.f32.mrf.mxu0 }
  0xea   :  { %v409_v22 = vpop.f32.mrf.mxu1 }
  0xeb   :  { %v584_v23 = vmax.f32 %v568_v20, 0.0  ;;  %v410_v25 = vadd.f32 %v409_v22, %v293_v21 }
  0xec   :  { %v765_v27 = vld [vmem:[#allocation2 + $0x58] sm:$0xff] }
  0xed   :  { %601 = vst.msk [vmem:[#allocation2 + $0x60] sm:$0xff] %vm588_vm2, %v584_v23  ;;  %v766_v28 = vmax.f32 %v762_v26, %v765_v27 }
  0xee   :  { %v527_v30 = vpop.f32.mrf.mxu2 }
  0xef   :  { %v549_v31 = vadd.f32 %v527_v30, %v410_v25  ;;  %939 = vmatmul.msk.f32.vlgmr.msra.gmra.mxu3 %vm588_vm2, %v766_v28 }
  0xf0   :  { %851 = vmatpush.msra.mxu3 %v942_v29 }
  0xf1   :  { %v569_v32 = vadd.f32 %v1093_v24, %v549_v31 }
  0xf3   :  { %v585_v33 = vmax.f32 %v569_v32, 0.0 }
  0xf4   :  { %v794_v34 = vld [vmem:[#allocation2 + $0x60] sm:$0xff] }
  0xf5   :  { %602 = vst.msk [vmem:[#allocation2 + $0x68] sm:$0xff] %vm588_vm2, %v585_v33 }
  0xfc   :  { %v797_v35 = vld [vmem:[#allocation2 + $0x68] sm:$0xff] }
  0xfd   :  { %v798_v36 = vmax.f32 %v794_v34, %v797_v35 }
  0xff   :  { %941 = vmatmul.msk.f32.vlgmr.msrb.gmra.mxu3 %vm588_vm2, %v798_v36 }
 0x107   :  { %943 = vmatmul.msk.f32.vlgmr.msra.gmra.mxu3 %vm588_vm2, %v830_v39 }
 0x132   :  { %v639_v40 = vpop.f32.mrf.mxu3 }
 0x13a   :  { %v662_v41 = vpop.f32.mrf.mxu3 }
 0x13b   :  { %v663_v24 = vadd.f32 %v662_v41, %v639_v40 }
 0x142   :  { %v693_v42 = vpop.f32.mrf.mxu3 }
 0x143   :  { %v696_v46 = vadd.f32 %v693_v42, %v663_v24 }
 0x152   :  { %v725_v43 = vpop.f32.mrf.mxu3 }
 0x153   :  { %v728_v48 = vadd.f32 %v725_v43, %v696_v46 }
 0x162   :  { %v757_v44 = vpop.f32.mrf.mxu3 }
 0x163   :  { %v760_v49 = vadd.f32 %v757_v44, %v728_v48 }
 0x172   :  { %v789_v45 = vpop.f32.mrf.mxu3 }
 0x173   :  { %v792_v50 = vadd.f32 %v789_v45, %v760_v49 }
 0x182   :  { %v821_v47 = vpop.f32.mrf.mxu3 }
 0x183   :  { %v824_v51 = vadd.f32 %v821_v47, %v792_v50 }
 0x18a   :  { %v853_v53 = vpop.f32.mrf.mxu3 }
 0x18b   :  { %v856_v54 = vadd.f32 %v853_v53, %v824_v51 }
 0x18d   :  { %v861_v55 = vadd.f32 %v948_v52, %v856_v54 }
 0x18f   :  { %863 = vst.msk [vmem:[%s1170_s5] sm:$0xff] %vm862_vm3, %v861_v55 }

</bundles_post_ra>
